<compile_context>
chip_gen: v7x
topology: tpu7x:2x2x1
jax: 0.10.0
libtpu: 0.0.40
codegen_flags: <defaults>
</compile_context>

<pallas_src>
import functools
import math

import jax
import jax.numpy as jnp
from jax.experimental import pallas as pl
from jax.experimental.pallas import tpu as pltpu

_LANES = 128


def _focal_loss_kernel(logits_ref, labels_ref, alpha_ref, out_ref,
                       num_acc, den_acc, *, gamma, tile_r, r_total,
                       acc_rows, need_row_mask):
    C = logits_ref.shape[0]
    j = pl.program_id(2)
    n_inner = pl.num_programs(2)

    @pl.when(j == 0)
    def _():
        num_acc[...] = jnp.zeros_like(num_acc)
        den_acc[...] = jnp.zeros_like(den_acc)

    lab = labels_ref[...].astype(jnp.int32)          # (tile_r, 128)

    # ---- streamed class reduction: only (tile_r,128) f32 arrays stay live ----
    # pass 1: running max over classes (pure VPU, logits planes re-read from
    # the VMEM block; never materialized as a (C, tile_r, 128) f32 temp).
    m = logits_ref[0].astype(jnp.float32)
    for c in range(1, C):
        m = jnp.maximum(m, logits_ref[c].astype(jnp.float32))

    # pass 2: running sum-exp plus the label gathers (z, exp(z), alpha) via
    # per-class scalar compares — no one-hot / iota materialization.
    sum_exp = jnp.zeros(m.shape, jnp.float32)
    z_lab = jnp.zeros(m.shape, jnp.float32)
    ez_lab = jnp.zeros(m.shape, jnp.float32)
    a_sel = jnp.zeros(m.shape, jnp.float32)
    for c in range(C):
        zc = logits_ref[c].astype(jnp.float32) - m
        ec = jnp.exp(zc)
        sum_exp = sum_exp + ec
        sel = lab == c
        z_lab = jnp.where(sel, zc, z_lab)
        ez_lab = jnp.where(sel, ec, ez_lab)
        a_sel = jnp.where(sel, alpha_ref[c], a_sel)   # scalar splat from SMEM

    lse = jnp.log(sum_exp)
    log_p = z_lab - lse
    # p from the already-gathered exp(z_label) and ONE exact reciprocal
    # (saves an EUP exp per element vs. exp(log_p)).
    p = ez_lab * pl.reciprocal(sum_exp)
    omp = jnp.maximum(1.0 - p, 0.0)
    g = float(gamma)
    if g.is_integer():
        focal = omp ** int(g)                    # integer_pow -> VPU multiplies
    else:
        focal = jnp.where(omp > 0.0,
                          jnp.exp(g * jnp.log(jnp.maximum(omp, 1e-37))),
                          0.0)
    loss = -(a_sel * focal * log_p)              # (tile_r, 128)

    if need_row_mask:
        # Ragged last R-tile: rows past r_total are out-of-bounds garbage.
        # Mask BOTH loss and a_sel before accumulation (correctness-critical).
        tile_idx = pl.program_id(1) * n_inner + j
        row = tile_idx * tile_r + jax.lax.broadcasted_iota(
            jnp.int32, (tile_r, _LANES), 0)
        valid = row < r_total
        loss = jnp.where(valid, loss, 0.0)
        a_sel = jnp.where(valid, a_sel, 0.0)

    # Lane-dense accumulation; the (tile_r//8, 8, 128) -> (8, 128) sum is
    # plain vreg adds (VPU) — no per-step XLU sublane reduce.
    if acc_rows == 8:
        num_acc[...] += jnp.sum(loss.reshape(tile_r // 8, 8, _LANES), axis=0)
        den_acc[...] += jnp.sum(a_sel.reshape(tile_r // 8, 8, _LANES), axis=0)
    else:
        num_acc[...] += jnp.sum(loss, axis=0, keepdims=True)
        den_acc[...] += jnp.sum(a_sel, axis=0, keepdims=True)

    @pl.when(j == n_inner - 1)
    def _():
        # Lane-dense writeback; the tiny cross-lane reduce happens in JAX.
        out_ref[0, :, :] = num_acc[...]
        out_ref[1, :, :] = den_acc[...]


def _pick_tile_r(R, C, x_itemsize, lab_itemsize, vmem_budget_bytes,
                 target_block_bytes):
    """Rows-of-128-lanes per block: big enough to amortize the ~0.35us/step
    overhead, small enough that double-buffered blocks + live f32 temporaries
    fit the per-generation VMEM budget.  Prefers a divisor of R so the
    ragged-row mask compiles out of every tile."""
    per_row = (2 * C * _LANES * x_itemsize      # double-buffered logits block
               + 2 * _LANES * lab_itemsize      # double-buffered labels block
               + 10 * _LANES * 4)               # live (tile_r, 128) f32 temps
    cap = max(8, vmem_budget_bytes // per_row)
    cap = min(cap, max(8, target_block_bytes // (C * _LANES * x_itemsize)))
    cap = int(min(cap, 2048))
    if R <= cap:
        return R                                # full dim: always legal
    cap8 = (cap // 8) * 8
    for d in range(cap8, 7, -8):                # largest mult-of-8 divisor of R
        if R % d == 0:
            return d
    return cap8                                 # ragged fallback (masked)


def focal_loss_pallas(pred_logit, label, gamma, alpha=None, *,
                      target_block_bytes=1 * 1024 * 1024):
    """pred_logit: (B, C, ...) float; label: (B, ...) int.  Returns scalar f32."""
    B, C = pred_logit.shape[0], pred_logit.shape[1]
    hw = int(math.prod(pred_logit.shape[2:]))

    x = pred_logit.reshape(B, C, hw)            # metadata-only reshape (NCHW kept)
    lab = label.reshape(B, hw).astype(jnp.int32)

    hw_pad = ((hw + _LANES - 1) // _LANES) * _LANES
    if hw_pad != hw:
        # TODO(synk): for non-lane-aligned spatial sizes this pad re-streams
        # the logits once through HBM; lane-aligned shapes (H*W % 128 == 0,
        # the common segmentation case) never take this branch.
        x = jnp.pad(x, ((0, 0), (0, 0), (0, hw_pad - hw)))
        lab = jnp.pad(lab, ((0, 0), (0, hw_pad - hw)), constant_values=-1)
    R = hw_pad // _LANES

    # Generation-aware VMEM budget (v5e/v6e: 128 MiB, v7x: 64 MiB per TC).
    try:
        vmem_cap = int(pltpu.get_tpu_info().vmem_capacity_bytes)
    except Exception:
        vmem_cap = 64 * 1024 * 1024             # conservative (v7x) fallback
    vmem_budget = vmem_cap // 2
    vmem_limit = max(32 * 1024 * 1024,
                     min(3 * vmem_cap // 4, 100 * 1024 * 1024))

    x_itemsize = jnp.dtype(x.dtype).itemsize
    tile_r = _pick_tile_r(R, C, x_itemsize, 4, vmem_budget, target_block_bytes)
    n_r = (R + tile_r - 1) // tile_r
    need_row_mask = (R % tile_r) != 0
    acc_rows = 8 if tile_r % 8 == 0 else 1

    # Ship labels as int8 when representable and the tile is int8-tileable:
    # cuts label HBM bytes 4x (matters most on HBM-bound v5e).
    if C <= 127 and tile_r % 32 == 0:
        lab = lab.astype(jnp.int8)

    x = x.reshape(B, C, R, _LANES)
    lab = lab.reshape(B, R, _LANES)

    if alpha is None:
        alpha_arr = jnp.ones((C,), dtype=jnp.float32)
    else:
        alpha_arr = jnp.asarray(alpha, dtype=jnp.float32).reshape(C)

    # Split the R-tile range over a second *parallel* axis so both v7x
    # TensorCores have work even when B == 1 (no effect on 1-TC v5e/v6e).
    n_outer = 2 if (n_r % 2 == 0 and n_r >= 2) else 1
    n_inner = n_r // n_outer

    kernel = functools.partial(
        _focal_loss_kernel, gamma=float(gamma), tile_r=tile_r, r_total=R,
        acc_rows=acc_rows, need_row_mask=need_row_mask)

    partials = pl.pallas_call(
        kernel,
        out_shape=jax.ShapeDtypeStruct((B, n_outer, 2, acc_rows, _LANES),
                                       jnp.float32),
        grid_spec=pltpu.PrefetchScalarGridSpec(
            num_scalar_prefetch=0,
            grid=(B, n_outer, n_inner),
            in_specs=[
                pl.BlockSpec((None, C, tile_r, _LANES),
                             lambda b, o, j: (b, 0, o * n_inner + j, 0)),
                pl.BlockSpec((None, tile_r, _LANES),
                             lambda b, o, j: (b, o * n_inner + j, 0)),
                pl.BlockSpec(memory_space=pltpu.MemorySpace.SMEM),
            ],
            out_specs=pl.BlockSpec((None, None, 2, acc_rows, _LANES),
                                   lambda b, o, j: (b, o, 0, 0, 0)),
            scratch_shapes=[
                pltpu.VMEM((acc_rows, _LANES), jnp.float32),
                pltpu.VMEM((acc_rows, _LANES), jnp.float32),
            ],
        ),
        compiler_params=pltpu.CompilerParams(
            dimension_semantics=("parallel", "parallel", "arbitrary"),
            vmem_limit_bytes=vmem_limit,
        ),
    )(x, lab, alpha_arr)

    num = jnp.sum(partials[:, :, 0])
    den = jnp.sum(partials[:, :, 1])
    return (num / den).astype(jnp.float32)


class FocalLoss:
    def __init__(self, gamma, alpha=None):
        self.gamma = gamma
        self.alpha = alpha

    def __call__(self, logits, target):
        return focal_loss_pallas(logits, target, self.gamma, self.alpha)


def _reference_focal_loss(pred_logit, label, gamma, alpha=None):
    B, C = pred_logit.shape[0], pred_logit.shape[1]
    if pred_logit.ndim > 2:
        perm = (0,) + tuple(range(2, pred_logit.ndim)) + (1,)
        flat = jnp.transpose(pred_logit, perm).reshape(-1, C)
    else:
        flat = pred_logit.reshape(-1, C)
    label = label.reshape(-1)
    log_p_all = jax.nn.log_softmax(flat.astype(jnp.float32), axis=-1)
    log_p = jnp.take_along_axis(log_p_all, label[:, None], axis=1)[:, 0]
    p = jnp.exp(log_p)
    if alpha is None:
        alpha = jnp.ones((C,), dtype=jnp.float32)
    a = alpha[label]
    loss = -a * jnp.power(1.0 - p, gamma) * log_p
    return loss.sum() / a.sum()


if __name__ == "__main__":
    key = jax.random.PRNGKey(0)
    k1, k2, k3, k4, k5, k6, k7, k8 = jax.random.split(key, 8)

    # Case 1: module-sized example (B=2, C=4, 16x16), integer gamma, per-class alpha.
    B, C, H, W = 2, 4, 16, 16
    logits = jax.random.normal(k1, (B, C, H, W), dtype=jnp.float32)
    target = jax.random.randint(k2, (B, H, W), 0, C, dtype=jnp.int32)
    gamma = 2.0
    alpha = jnp.array([0.25, 0.5, 0.75, 1.0], dtype=jnp.float32)
    mod = FocalLoss(gamma=gamma, alpha=alpha)
    out = jax.block_until_ready(mod(logits, target))
    ref = _reference_focal_loss(logits, target, gamma, alpha)
    assert jnp.allclose(out, ref, rtol=1e-5, atol=1e-5), (out, ref)

    # Case 2: multi-tile path with a forced tiny block (R=18, tile_r=16 ->
    # ragged-row mask), outer parallel split, non-integer gamma, alpha=None.
    logits2 = jax.random.normal(k3, (2, 4, 48, 48), dtype=jnp.float32)
    target2 = jax.random.randint(k4, (2, 48, 48), 0, 4, dtype=jnp.int32)
    out2 = jax.block_until_ready(
        focal_loss_pallas(logits2, target2, gamma=1.5, alpha=None,
                          target_block_bytes=32 * 1024))
    ref2 = _reference_focal_loss(logits2, target2, 1.5, None)
    assert jnp.allclose(out2, ref2, rtol=1e-5, atol=1e-5), (out2, ref2)

    # Case 3: B=1 (outer parallel split carries the work), divisor tile_r=32,
    # int8 label path, multi-step inner reduction axis.
    logits3 = jax.random.normal(k5, (1, 4, 64, 256), dtype=jnp.float32)
    target3 = jax.random.randint(k6, (1, 64, 256), 0, 4, dtype=jnp.int32)
    out3 = jax.block_until_ready(
        focal_loss_pallas(logits3, target3, gamma=2.0, alpha=None,
                          target_block_bytes=64 * 1024))
    ref3 = _reference_focal_loss(logits3, target3, 2.0, None)
    assert jnp.allclose(out3, ref3, rtol=1e-4, atol=1e-5), (out3, ref3)

    # Case 4: non-lane-aligned spatial size (10x10 -> padded lanes, label=-1),
    # odd class count C=3 with per-class alpha from SMEM.
    logits4 = jax.random.normal(k7, (2, 3, 10, 10), dtype=jnp.float32)
    target4 = jax.random.randint(k8, (2, 10, 10), 0, 3, dtype=jnp.int32)
    alpha4 = jnp.array([0.3, 0.5, 0.9], dtype=jnp.float32)
    out4 = jax.block_until_ready(
        focal_loss_pallas(logits4, target4, gamma=2.0, alpha=alpha4))
    ref4 = _reference_focal_loss(logits4, target4, 2.0, alpha4)
    assert jnp.allclose(out4, ref4, rtol=1e-5, atol=1e-5), (out4, ref4)

    print("KERNEL_OK")
</pallas_src>

<mosaic_0001>
module attributes {stable_mosaic.version = 11 : i64} {
  func.func @_focal_loss_kernel(%arg0: i32, %arg1: i32, %arg2: i32, %arg3: memref<1x4x2x128xf32, #tpu.memory_space<vmem>>, %arg4: memref<1x2x128xi32, #tpu.memory_space<vmem>>, %arg5: memref<4xf32, #tpu.memory_space<smem>>, %arg6: memref<1x1x2x1x128xf32, #tpu.memory_space<vmem>>, %arg7: memref<1x128xf32, #tpu.memory_space<vmem>>, %arg8: memref<1x128xf32, #tpu.memory_space<vmem>>) attributes {dimension_semantics = [#tpu.dimension_semantics<parallel>, #tpu.dimension_semantics<parallel>, #tpu.dimension_semantics<arbitrary>], iteration_bounds = array<i64: 2, 1, 1>, scalar_prefetch = 0 : i64, scratch_operands = 2 : i64, tpu.core_type = #tpu.core_type<tc>, window_params = [{transform_indices = @transform_0, window_bounds = array<i64: 1, 4, 2, 128>}, {transform_indices = @transform_1, window_bounds = array<i64: 1, 2, 128>}, {transform_indices = @transform_2, window_bounds = array<i64: 4>}, {transform_indices = @transform_3, window_bounds = array<i64: 1, 1, 2, 1, 128>}]} {
    %c0_i32 = arith.constant 0 : i32
    %0 = arith.cmpi eq, %arg2, %c0_i32 : i32
    %1 = arith.extui %0 : i1 to i32
    %c0_i32_0 = arith.constant 0 : i32
    %2 = arith.cmpi ne, %1, %c0_i32_0 : i32
    scf.if %2 {
      %cst_55 = arith.constant 0.000000e+00 : f32
      %94 = vector.broadcast %cst_55 : f32 to vector<1x128xf32>
      %c0_56 = arith.constant 0 : index
      %c0_57 = arith.constant 0 : index
      %95 = vector.load %arg7[%c0_56, %c0_57] : memref<1x128xf32, #tpu.memory_space<vmem>>, vector<1x128xf32>
      tpu.vector_store %arg7[%c0_56, %c0_57], %94 {strides = array<i32>} : memref<1x128xf32, #tpu.memory_space<vmem>>, vector<1x128xf32>,
      %cst_58 = arith.constant 0.000000e+00 : f32
      %96 = vector.broadcast %cst_58 : f32 to vector<1x128xf32>
      %c0_59 = arith.constant 0 : index
      %c0_60 = arith.constant 0 : index
      %97 = vector.load %arg8[%c0_59, %c0_60] : memref<1x128xf32, #tpu.memory_space<vmem>>, vector<1x128xf32>
      tpu.vector_store %arg8[%c0_59, %c0_60], %96 {strides = array<i32>} : memref<1x128xf32, #tpu.memory_space<vmem>>, vector<1x128xf32>,
    } else {
    }
    %c0 = arith.constant 0 : index
    %c0_1 = arith.constant 0 : index
    %c0_2 = arith.constant 0 : index
    %3 = vector.load %arg4[%c0, %c0_1, %c0_2] : memref<1x2x128xi32, #tpu.memory_space<vmem>>, vector<1x2x128xi32>
    %4 = vector.shape_cast %3 : vector<1x2x128xi32> to vector<2x128xi32>
    %c0_3 = arith.constant 0 : index
    %c0_4 = arith.constant 0 : index
    %c0_5 = arith.constant 0 : index
    %c0_6 = arith.constant 0 : index
    %5 = vector.load %arg3[%c0_3, %c0_4, %c0_5, %c0_6] : memref<1x4x2x128xf32, #tpu.memory_space<vmem>>, vector<1x1x2x128xf32>
    %6 = vector.shape_cast %5 : vector<1x1x2x128xf32> to vector<2x128xf32>
    %c0_7 = arith.constant 0 : index
    %c1 = arith.constant 1 : index
    %c0_8 = arith.constant 0 : index
    %c0_9 = arith.constant 0 : index
    %7 = vector.load %arg3[%c0_7, %c1, %c0_8, %c0_9] : memref<1x4x2x128xf32, #tpu.memory_space<vmem>>, vector<1x1x2x128xf32>
    %8 = vector.shape_cast %7 : vector<1x1x2x128xf32> to vector<2x128xf32>
    %9 = arith.maximumf %6, %8 : vector<2x128xf32>
    %c0_10 = arith.constant 0 : index
    %c2 = arith.constant 2 : index
    %c0_11 = arith.constant 0 : index
    %c0_12 = arith.constant 0 : index
    %10 = vector.load %arg3[%c0_10, %c2, %c0_11, %c0_12] : memref<1x4x2x128xf32, #tpu.memory_space<vmem>>, vector<1x1x2x128xf32>
    %11 = vector.shape_cast %10 : vector<1x1x2x128xf32> to vector<2x128xf32>
    %12 = arith.maximumf %9, %11 : vector<2x128xf32>
    %c0_13 = arith.constant 0 : index
    %c3 = arith.constant 3 : index
    %c0_14 = arith.constant 0 : index
    %c0_15 = arith.constant 0 : index
    %13 = vector.load %arg3[%c0_13, %c3, %c0_14, %c0_15] : memref<1x4x2x128xf32, #tpu.memory_space<vmem>>, vector<1x1x2x128xf32>
    %14 = vector.shape_cast %13 : vector<1x1x2x128xf32> to vector<2x128xf32>
    %15 = arith.maximumf %12, %14 : vector<2x128xf32>
    %cst = arith.constant 0.000000e+00 : f32
    %16 = vector.broadcast %cst : f32 to vector<2x128xf32>
    %cst_16 = arith.constant 0.000000e+00 : f32
    %17 = vector.broadcast %cst_16 : f32 to vector<2x128xf32>
    %cst_17 = arith.constant 0.000000e+00 : f32
    %18 = vector.broadcast %cst_17 : f32 to vector<2x128xf32>
    %cst_18 = arith.constant 0.000000e+00 : f32
    %19 = vector.broadcast %cst_18 : f32 to vector<2x128xf32>
    %c0_19 = arith.constant 0 : index
    %c0_20 = arith.constant 0 : index
    %c0_21 = arith.constant 0 : index
    %c0_22 = arith.constant 0 : index
    %20 = vector.load %arg3[%c0_19, %c0_20, %c0_21, %c0_22] : memref<1x4x2x128xf32, #tpu.memory_space<vmem>>, vector<1x1x2x128xf32>
    %21 = vector.shape_cast %20 : vector<1x1x2x128xf32> to vector<2x128xf32>
    %22 = arith.subf %21, %15 : vector<2x128xf32>
    %23 = math.exp %22 : vector<2x128xf32>
    %24 = arith.addf %16, %23 : vector<2x128xf32>
    %c0_i32_23 = arith.constant 0 : i32
    %25 = vector.broadcast %c0_i32_23 : i32 to vector<2x128xi32>
    %26 = arith.cmpi eq, %4, %25 : vector<2x128xi32>
    %27 = arith.select %26, %22, %17 : vector<2x128xi1>, vector<2x128xf32>
    %28 = arith.select %26, %23, %18 : vector<2x128xi1>, vector<2x128xf32>
    %c0_24 = arith.constant 0 : index
    %29 = memref.load %arg5[%c0_24] : memref<4xf32, #tpu.memory_space<smem>>
    %30 = vector.broadcast %29 : f32 to vector<2x128xf32>
    %31 = arith.select %26, %30, %19 : vector<2x128xi1>, vector<2x128xf32>
    %c0_25 = arith.constant 0 : index
    %c1_26 = arith.constant 1 : index
    %c0_27 = arith.constant 0 : index
    %c0_28 = arith.constant 0 : index
    %32 = vector.load %arg3[%c0_25, %c1_26, %c0_27, %c0_28] : memref<1x4x2x128xf32, #tpu.memory_space<vmem>>, vector<1x1x2x128xf32>
    %33 = vector.shape_cast %32 : vector<1x1x2x128xf32> to vector<2x128xf32>
    %34 = arith.subf %33, %15 : vector<2x128xf32>
    %35 = math.exp %34 : vector<2x128xf32>
    %36 = arith.addf %24, %35 : vector<2x128xf32>
    %c1_i32 = arith.constant 1 : i32
    %37 = vector.broadcast %c1_i32 : i32 to vector<2x128xi32>
    %38 = arith.cmpi eq, %4, %37 : vector<2x128xi32>
    %39 = arith.select %38, %34, %27 : vector<2x128xi1>, vector<2x128xf32>
    %40 = arith.select %38, %35, %28 : vector<2x128xi1>, vector<2x128xf32>
    %c1_29 = arith.constant 1 : index
    %41 = memref.load %arg5[%c1_29] : memref<4xf32, #tpu.memory_space<smem>>
    %42 = vector.broadcast %41 : f32 to vector<2x128xf32>
    %43 = arith.select %38, %42, %31 : vector<2x128xi1>, vector<2x128xf32>
    %c0_30 = arith.constant 0 : index
    %c2_31 = arith.constant 2 : index
    %c0_32 = arith.constant 0 : index
    %c0_33 = arith.constant 0 : index
    %44 = vector.load %arg3[%c0_30, %c2_31, %c0_32, %c0_33] : memref<1x4x2x128xf32, #tpu.memory_space<vmem>>, vector<1x1x2x128xf32>
    %45 = vector.shape_cast %44 : vector<1x1x2x128xf32> to vector<2x128xf32>
    %46 = arith.subf %45, %15 : vector<2x128xf32>
    %47 = math.exp %46 : vector<2x128xf32>
    %48 = arith.addf %36, %47 : vector<2x128xf32>
    %c2_i32 = arith.constant 2 : i32
    %49 = vector.broadcast %c2_i32 : i32 to vector<2x128xi32>
    %50 = arith.cmpi eq, %4, %49 : vector<2x128xi32>
    %51 = arith.select %50, %46, %39 : vector<2x128xi1>, vector<2x128xf32>
    %52 = arith.select %50, %47, %40 : vector<2x128xi1>, vector<2x128xf32>
    %c2_34 = arith.constant 2 : index
    %53 = memref.load %arg5[%c2_34] : memref<4xf32, #tpu.memory_space<smem>>
    %54 = vector.broadcast %53 : f32 to vector<2x128xf32>
    %55 = arith.select %50, %54, %43 : vector<2x128xi1>, vector<2x128xf32>
    %c0_35 = arith.constant 0 : index
    %c3_36 = arith.constant 3 : index
    %c0_37 = arith.constant 0 : index
    %c0_38 = arith.constant 0 : index
    %56 = vector.load %arg3[%c0_35, %c3_36, %c0_37, %c0_38] : memref<1x4x2x128xf32, #tpu.memory_space<vmem>>, vector<1x1x2x128xf32>
    %57 = vector.shape_cast %56 : vector<1x1x2x128xf32> to vector<2x128xf32>
    %58 = arith.subf %57, %15 : vector<2x128xf32>
    %59 = math.exp %58 : vector<2x128xf32>
    %60 = arith.addf %48, %59 : vector<2x128xf32>
    %c3_i32 = arith.constant 3 : i32
    %61 = vector.broadcast %c3_i32 : i32 to vector<2x128xi32>
    %62 = arith.cmpi eq, %4, %61 : vector<2x128xi32>
    %63 = arith.select %62, %58, %51 : vector<2x128xi1>, vector<2x128xf32>
    %64 = arith.select %62, %59, %52 : vector<2x128xi1>, vector<2x128xf32>
    %c3_39 = arith.constant 3 : index
    %65 = memref.load %arg5[%c3_39] : memref<4xf32, #tpu.memory_space<smem>>
    %66 = vector.broadcast %65 : f32 to vector<2x128xf32>
    %67 = arith.select %62, %66, %55 : vector<2x128xi1>, vector<2x128xf32>
    %68 = math.log %60 : vector<2x128xf32>
    %69 = arith.subf %63, %68 : vector<2x128xf32>
    %70 = tpu.reciprocal %60 : vector<2x128xf32> -> vector<2x128xf32>
    %71 = arith.mulf %64, %70 : vector<2x128xf32>
    %cst_40 = arith.constant 1.000000e+00 : f32
    %72 = vector.broadcast %cst_40 : f32 to vector<2x128xf32>
    %73 = arith.subf %72, %71 : vector<2x128xf32>
    %cst_41 = arith.constant 0.000000e+00 : f32
    %74 = vector.broadcast %cst_41 : f32 to vector<2x128xf32>
    %75 = arith.maximumf %73, %74 : vector<2x128xf32>
    %76 = arith.mulf %75, %75 : vector<2x128xf32>
    %77 = arith.mulf %67, %76 : vector<2x128xf32>
    %78 = arith.mulf %77, %69 : vector<2x128xf32>
    %cst_42 = arith.constant 0.000000e+00 : f32
    %79 = vector.broadcast %cst_42 : f32 to vector<2x128xf32>
    %80 = arith.subf %79, %78 : vector<2x128xf32>
    %c0_43 = arith.constant 0 : index
    %c0_44 = arith.constant 0 : index
    %81 = vector.load %arg7[%c0_43, %c0_44] : memref<1x128xf32, #tpu.memory_space<vmem>>, vector<1x128xf32>
    %cst_45 = arith.constant dense<0.000000e+00> : vector<128xf32>
    %82 = vector.multi_reduction <add>, %80, %cst_45 [0] : vector<2x128xf32> to vector<128xf32>
    %83 = vector.shape_cast %82 : vector<128xf32> to vector<1x128xf32>
    %84 = arith.addf %81, %83 : vector<1x128xf32>
    %c0_46 = arith.constant 0 : index
    %c0_47 = arith.constant 0 : index
    %85 = vector.load %arg7[%c0_46, %c0_47] : memref<1x128xf32, #tpu.memory_space<vmem>>, vector<1x128xf32>
    tpu.vector_store %arg7[%c0_46, %c0_47], %84 {strides = array<i32>} : memref<1x128xf32, #tpu.memory_space<vmem>>, vector<1x128xf32>,
    %c0_48 = arith.constant 0 : index
    %c0_49 = arith.constant 0 : index
    %86 = vector.load %arg8[%c0_48, %c0_49] : memref<1x128xf32, #tpu.memory_space<vmem>>, vector<1x128xf32>
    %cst_50 = arith.constant dense<0.000000e+00> : vector<128xf32>
    %87 = vector.multi_reduction <add>, %67, %cst_50 [0] : vector<2x128xf32> to vector<128xf32>
    %88 = vector.shape_cast %87 : vector<128xf32> to vector<1x128xf32>
    %89 = arith.addf %86, %88 : vector<1x128xf32>
    %c0_51 = arith.constant 0 : index
    %c0_52 = arith.constant 0 : index
    %90 = vector.load %arg8[%c0_51, %c0_52] : memref<1x128xf32, #tpu.memory_space<vmem>>, vector<1x128xf32>
    tpu.vector_store %arg8[%c0_51, %c0_52], %89 {strides = array<i32>} : memref<1x128xf32, #tpu.memory_space<vmem>>, vector<1x128xf32>,
    %c0_i32_53 = arith.constant 0 : i32
    %91 = arith.cmpi eq, %arg2, %c0_i32_53 : i32
    %92 = arith.extui %91 : i1 to i32
    %c0_i32_54 = arith.constant 0 : i32
    %93 = arith.cmpi ne, %92, %c0_i32_54 : i32
    scf.if %93 {
      %c0_55 = arith.constant 0 : index
      %c0_56 = arith.constant 0 : index
      %94 = vector.load %arg7[%c0_55, %c0_56] : memref<1x128xf32, #tpu.memory_space<vmem>>, vector<1x128xf32>
      %c0_57 = arith.constant 0 : index
      %c0_58 = arith.constant 0 : index
      %c0_59 = arith.constant 0 : index
      %c0_60 = arith.constant 0 : index
      %c0_61 = arith.constant 0 : index
      %95 = vector.load %arg6[%c0_57, %c0_58, %c0_59, %c0_60, %c0_61] : memref<1x1x2x1x128xf32, #tpu.memory_space<vmem>>, vector<1x1x1x1x128xf32>
      %96 = vector.shape_cast %95 : vector<1x1x1x1x128xf32> to vector<1x128xf32>
      %97 = vector.shape_cast %94 : vector<1x128xf32> to vector<1x1x1x1x128xf32>
      tpu.vector_store %arg6[%c0_57, %c0_58, %c0_59, %c0_60, %c0_61], %97 {strides = array<i32>} : memref<1x1x2x1x128xf32, #tpu.memory_space<vmem>>, vector<1x1x1x1x128xf32>,
      %c0_62 = arith.constant 0 : index
      %c0_63 = arith.constant 0 : index
      %98 = vector.load %arg8[%c0_62, %c0_63] : memref<1x128xf32, #tpu.memory_space<vmem>>, vector<1x128xf32>
      %c0_64 = arith.constant 0 : index
      %c0_65 = arith.constant 0 : index
      %c1_66 = arith.constant 1 : index
      %c0_67 = arith.constant 0 : index
      %c0_68 = arith.constant 0 : index
      %99 = vector.load %arg6[%c0_64, %c0_65, %c1_66, %c0_67, %c0_68] : memref<1x1x2x1x128xf32, #tpu.memory_space<vmem>>, vector<1x1x1x1x128xf32>
      %100 = vector.shape_cast %99 : vector<1x1x1x1x128xf32> to vector<1x128xf32>
      %101 = vector.shape_cast %98 : vector<1x128xf32> to vector<1x1x1x1x128xf32>
      tpu.vector_store %arg6[%c0_64, %c0_65, %c1_66, %c0_67, %c0_68], %101 {strides = array<i32>} : memref<1x1x2x1x128xf32, #tpu.memory_space<vmem>>, vector<1x1x1x1x128xf32>,
    } else {
    }
    return
  }
  func.func @transform_0(%arg0: i32, %arg1: i32, %arg2: i32) -> (i32, i32, i32, i32) {
    %c1_i32 = arith.constant 1 : i32
    %0 = arith.muli %arg1, %c1_i32 : i32
    %1 = arith.addi %0, %arg2 : i32
    %c0_i32 = arith.constant 0 : i32
    %c0_i32_0 = arith.constant 0 : i32
    %c0_i32_1 = arith.constant 0 : i32
    return %arg0, %c0_i32, %1, %c0_i32_0 : i32, i32, i32, i32
  }
  func.func @transform_1(%arg0: i32, %arg1: i32, %arg2: i32) -> (i32, i32, i32) {
    %c1_i32 = arith.constant 1 : i32
    %0 = arith.muli %arg1, %c1_i32 : i32
    %1 = arith.addi %0, %arg2 : i32
    %c0_i32 = arith.constant 0 : i32
    %c0_i32_0 = arith.constant 0 : i32
    return %arg0, %1, %c0_i32 : i32, i32, i32
  }
  func.func @transform_2(%arg0: i32, %arg1: i32, %arg2: i32) -> i32 {
    %c0_i32 = arith.constant 0 : i32
    %c0_i32_0 = arith.constant 0 : i32
    return %c0_i32 : i32
  }
  func.func @transform_3(%arg0: i32, %arg1: i32, %arg2: i32) -> (i32, i32, i32, i32, i32) {
    %c0_i32 = arith.constant 0 : i32
    %c0_i32_0 = arith.constant 0 : i32
    %c0_i32_1 = arith.constant 0 : i32
    %c0_i32_2 = arith.constant 0 : i32
    return %arg0, %arg1, %c0_i32, %c0_i32_0, %c0_i32_1 : i32, i32, i32, i32, i32
  }
}

</mosaic_0001>

<bundles_post_ra>
// kernel: tpu_custom_call.1
= control target key start
LH: loop header
LB: loop body
LE: loop exit
PB: predicated region body
PF: predicated region fallthrough
CT: control target
= control target key end

     0   :  { %s1124_s0 = inlined_call_operand.hbm [shape: f32[2,4,2,128], index: 0, kind: input, shape index: {}]   ;;  %s1125_s1 = inlined_call_operand.hbm [shape: s32[2,2,128], index: 1, kind: input, shape index: {}]   ;;  %s1126_s2 = inlined_call_operand.vmem [shape: f32[4], index: 2, kind: input, shape index: {}]   ;;  %s1127_s3 = inlined_call_operand.hbm [shape: f32[2,1,2,1,128], index: 3, kind: output, shape index: {}]  }
   0x1   :  { %1133 = sst [smem:[#allocation16_spill]] %s1124_s0 }
   0x2   :  { %1134 = sst [smem:[#allocation17_spill]] %s1126_s2 }
   0x3   :  { %8 = vsyncpa [#allocation5], 0 }
   0x4   :  { %10 = vsyncpa [#allocation5 + $0x1], 0 }
   0x5   :  { %11 = vsyncpa [#allocation9], 0 }
   0x6   :  { %13 = vsyncpa [#allocation9 + $0x1], 0 }
   0x7   :  { %14 = vsyncpa [#allocation7], 0 }
   0x8   :  { %15 = vsyncpa [#allocation6], 0 }
   0x9   :  { %17 = vsyncpa [#allocation6 + $0x1], 0  ;;  %s835_s12 = smov 0   ;;  %s837_s13 = smov 0  }
   0xa   :  { %s839_s14 = smov 0   ;;  %s841_s15 = smov 0  }
   0xb   :  { %s843_s16 = smov 0   ;;  %s845_s17 = smov 0  }
   0xc LB: > { %s515_s18 = sadd.s32 4294967295, %s804_s17   ;;  %s516_s19 = sadd.s32 4294967294, %s804_s17   ;;  %s804_s17 = sphi %s845_s17, %s23_s17   ;;  %s800_s16 = sphi %s843_s16, %s1156_s16   ;;  %s796_s15 = sphi %s841_s15, %s1155_s15   ;;  %s792_s14 = sphi %s839_s14, %s1154_s14   ;;  %s788_s13 = sphi %s837_s13, %s1153_s13   ;;  %s784_s12 = sphi %s835_s12, %s1152_s12  }
   0xd   : > { %s53_s20 = sadd.s32 1, %s792_s14  ;;  %p60_p0 = scmp.ne.s32.totalorder %s792_s14, %s788_s13 }
   0xe   : > { %p61_p1 = scmp.eq.s32.totalorder %s804_s17, 0  ;;  %p66_p2 = scmp.ne.s32.totalorder %s788_s13, %s784_s12 }
   0xf   : > { %p873_p3 = scmp.eq.s32.totalorder %s515_s18, 0  ;;  %p143_p4 = scmp.eq.s32.totalorder %s515_s18, 1 }
  0x10   : > { %p877_p5 = por %p61_p1, %p60_p0  ;;  %p149_p6 = scmp.eq.s32.totalorder %s516_s19, 1 }
  0x11   : > { %s1135_s21 = scalar_select %p873_p3, 1, 0 }
  0x12   : > { %p883_p7 = por %p873_p3, %p66_p2  ;;  %p887_p8 = por %p143_p4, %p60_p0 }
  0x13   : > { %p891_p9 = por %p149_p6, %p66_p2  ;;  %p517_p10 = scmp.ge.s32.totalorder %s804_s17, 1 }
  0x14   : > { %s1137_s23 = scalar_select %p883_p7, 1, 0 }
  0x15   : > { %s1138_s24 = scalar_select %p887_p8, 1, 0 }
  0x16   : > { %s1139_s25 = scalar_select %p891_p9, 1, 0 }
  0x17   : > { %p156_p11 = scmp.lt.s32.totalorder %s804_s17, 3  ;;  %s1140_s2 = sld [smem:[#allocation17_spill]] }
  0x18   : > { %p570_p0 = scmp.lt.s32.totalorder %s804_s17, 2  ;;  %s42_s5 = sadd.s32 1, %s800_s16 }
  0x19   : > { %p900_p12 = pnand %p517_p10, %p156_p11  ;;  %p921_p6 = scmp.ge.s32.totalorder %s42_s5, 2 }
  0x1a   : > { %p910_p2 = pnand %p570_p0, %p877_p5  ;;  %s926_s7 = sand.u32 1, %s792_s14  }
  0x1b   : > { %s1141_s29 = scalar_select %p900_p12, 1, 0 }
  0x1c   : > { %p554_p1 = pneg %p900_p12 }
  0x1d   : > { %s169_s28 = sshll.u32 %s1140_s2, 4  ;;  %s170_s28 = int_to_ptr.vmem [resolvable:$true] %s169_s28 }
  0x1e   : > { %p916_p4 = pnand %p554_p1, %p873_p3  ;;  %s639_s8 = scalar_lea.vmem %s170_s28, 16 }
  0x1f   : > { %p640_p10 = scmp.ne.s32.totalorder %s170_s28, %s639_s8  ;;  %p647_p13 = scmp.lt.s32.totalorder %s170_s28, %s170_s28 }
  0x20   : > { %p641_p5 = pneg %p916_p4  ;;  %p648_p9 = scmp.lt.s32.totalorder %s639_s8, %s639_s8 }
  0x22   : > { %p642_p11 = pnand %p641_p5, %p640_p10  ;;  %p649_p1 = por %p648_p9, %p647_p13 }
  0x24   : > { %p643_p0 = pneg %p642_p11 }
  0x26   : > { %p650_p8 = pnand %p649_p1, %p643_p0 }
  0x28   : > { %653 = shalt.err (!%p650_p8)
}
  0x29   : > { %s806_s9 = smov [#allocation10]   ;;  %s1158_s5 = smov (%p921_p6, %s42_s5), 0 }
  0x2a   : > { %557 = dma.vmem_to_smem (!%p916_p4), %s170_s28, 16, %s806_s9, [#allocation7]  }
  0x2b   : > { %s520_s10 = sshll.u32 %s926_s7, 3  ;;  %s48_s11 = ssub.s32 %s800_s16, %s1158_s5 }
  0x2c   : > { %p51_p8 = scmp.eq.s32.totalorder %s48_s11, 0  ;;  %s542_s18 = sshll.u32 %s800_s16, 7 }
  0x2d   : > { %s1145_s0 = sld [smem:[#allocation16_spill]]  ;;  %s184_s27 = scalar_lea.vmem [#allocation4], %s520_s10 }
  0x2e   : > { %s193_s4 = sshll.u32 %s184_s27, 4  ;;  %s181_s6 = scalar_lea.sflag [#allocation5], %s926_s7  ;;  %s950_s4 = int_to_ptr.vmem [resolvable:$true] %s193_s4 }
  0x2f   : > { %s948_s28 = scalar_select %p51_p8, %s792_s14, %s53_s20  }
  0x30   : > { %p656_p13 = pneg %p910_p2 }
  0x33   : > { %s943_s26 = scalar_lea.hbm %s1145_s0, %s542_s18  ;;  %s659_s18 = scalar_lea.hbm %s1145_s0, 256 }
  0x34   : > { %s654_s8 = scalar_lea.hbm %s943_s26, 128  ;;  %p660_p10 = scmp.lt.u32.totalorder %s943_s26, %s1145_s0 }
  0x35   : > { %p655_p9 = scmp.ne.s32.totalorder %s943_s26, %s654_s8  ;;  %p661_p5 = scmp.lt.u32.totalorder %s659_s18, %s654_s8 }
  0x36   : > { %p663_p0 = scmp.lt.u32.totalorder %s654_s8, %s943_s26 }
  0x37   : > { %p657_p4 = pnand %p656_p13, %p655_p9  ;;  %p662_p11 = por %p661_p5, %p660_p10 }
  0x39   : > { %p658_p6 = pneg %p657_p4  ;;  %p664_p1 = por %p663_p0, %p662_p11 }
  0x3b   : > { %p665_p8 = pnand %p664_p1, %p658_p6 }
  0x3d   : > { %668 = shalt.err (!%p665_p8)
}
  0x3e   : > { %s669_s20 = scalar_lea.vmem %s950_s4, 128  ;;  %s807_s22 = smov [#allocation4]  }
  0x3f   : > { %p670_p9 = scmp.ne.s32.totalorder %s950_s4, %s669_s20  ;;  %s674_s27 = sshll.u32 %s807_s22, 4  ;;  %s675_s27 = int_to_ptr.vmem [resolvable:$false] %s674_s27 }
  0x40   : > { %s676_s9 = scalar_lea.vmem %s675_s27, 256  ;;  %p677_p7 = scmp.lt.s32.totalorder %s950_s4, %s675_s27 }
  0x41   : > { %p672_p4 = pnand %p670_p9, %p656_p13  ;;  %p678_p10 = scmp.lt.s32.totalorder %s676_s9, %s669_s20 }
  0x43   : > { %p673_p3 = pneg %p672_p4  ;;  %p679_p5 = por %p678_p10, %p677_p7 }
  0x45   : > { %p680_p11 = pnand %p679_p5, %p673_p3 }
  0x47   : > { %683 = shalt.err (!%p680_p11)
}
  0x48   : > { %s808_s8 = smov 32   ;;  %s809_s11 = smov 2  }
  0x49   : > { %561 = dma.hbm_to_vmem [thread:$0]  (!%p910_p2), %s943_s26, 128, %s950_s4, %s181_s6, %s808_s8, %s808_s8, %s809_s11  }
  0x4a   : > { %s523_s18 = sshll.u32 %s926_s7, 1  ;;  %s524_s10 = sshll.u32 %s800_s16, 5 }
  0x4b   : > { %s985_s22 = scalar_lea.hbm %s1125_s1, %s524_s10  ;;  %s207_s27 = scalar_lea.vmem [#allocation8], %s523_s18 }
  0x4c   : > { %s216_s9 = sshll.u32 %s207_s27, 4  ;;  %s204_s0 = scalar_lea.sflag [#allocation9], %s926_s7  ;;  %s217_s9 = int_to_ptr.vmem [resolvable:$true] %s216_s9 }
  0x4d   : > { %s684_s2 = scalar_lea.hbm %s985_s22, 32  ;;  %s689_s6 = scalar_lea.hbm %s1125_s1, 64 }
  0x4e   : > { %p685_p3 = scmp.ne.s32.totalorder %s985_s22, %s684_s2  ;;  %p690_p0 = scmp.lt.u32.totalorder %s985_s22, %s1125_s1 }
  0x4f   : > { %p691_p1 = scmp.lt.u32.totalorder %s689_s6, %s684_s2  ;;  %p693_p9 = scmp.lt.u32.totalorder %s684_s2, %s985_s22 }
  0x50   : > { %p687_p7 = pnand %p685_p3, %p656_p13 }
  0x51   : > { %p692_p8 = por %p691_p1, %p690_p0 }
  0x52   : > { %p688_p6 = pneg %p687_p7 }
  0x53   : > { %p694_p4 = por %p693_p9, %p692_p8 }
  0x55   : > { %p695_p10 = pnand %p694_p4, %p688_p6 }
  0x57   : > { %698 = shalt.err (!%p695_p10)
}
  0x58   : > { %s699_s7 = scalar_lea.vmem %s217_s9, 32  ;;  %s810_s18 = smov [#allocation8]  }
  0x59   : > { %p700_p5 = scmp.ne.s32.totalorder %s217_s9, %s699_s7  ;;  %s704_s10 = sshll.u32 %s810_s18, 4  ;;  %s705_s10 = int_to_ptr.vmem [resolvable:$false] %s704_s10 }
  0x5a   : > { %s706_s19 = scalar_lea.vmem %s705_s10, 64  ;;  %p707_p7 = scmp.lt.s32.totalorder %s217_s9, %s705_s10 }
  0x5b   : > { %p702_p11 = pnand %p700_p5, %p656_p13  ;;  %p708_p12 = scmp.lt.s32.totalorder %s706_s19, %s699_s7 }
  0x5d   : > { %p703_p3 = pneg %p702_p11  ;;  %p709_p0 = por %p708_p12, %p707_p7 }
  0x5f   : > { %p710_p1 = pnand %p709_p0, %p703_p3 }
  0x61   : > { %713 = shalt.err (!%p710_p1)
}
  0x62   : > { %564 = dma.hbm_to_vmem [thread:$0]  (!%p910_p2), %s985_s22, 32, %s217_s9, %s204_s0  }
  0x63   : > { %p1146_p6 = scmp.ne.s32.totalorder %s1141_s29, 0 }
  0x64   : > { %s1010_s2 = sand.u32 (!%p1146_p6), 1, %s788_s13   ;;  %p1147_p13 = scmp.ne.s32.totalorder (!%p1146_p6), %s1137_s23, 0 }
  0x65   : > { %225 = sbr.rel (%p1146_p6) target bundleno = 210 (0xd2), region = 32  ;;  %s526_s20 = sshll.u32 (!%p1146_p6), %s1010_s2, 3 }
  0x66   : > { %s228_s27 = scalar_lea.sflag (!%p1146_p6), [#allocation5], %s1010_s2  ;;  %s231_s26 = scalar_lea.vmem (!%p1146_p6), [#allocation4], %s526_s20 }
  0x6c   : > { %767 = dma.done.wait (%p1147_p13), %s228_s27, 128  }
  0x6d   : > { %769 = vsyncadd (%p1147_p13), %s228_s27, 4294967168  ;;  %s527_s0 = sshll.u32 %s1010_s2, 1  ;;  %s237_s29 = scalar_lea.sflag [#allocation9], %s1010_s2 }
  0x6e   : > { %s240_s30 = scalar_lea.vmem [#allocation8], %s527_s0 }
  0x6f   : > { %771 = dma.done.wait (%p1147_p13), %s237_s29, 32  }
  0x70   : > { %773 = vsyncadd (%p1147_p13), %s237_s29, 4294967264  ;;  %p1148_p12 = scmp.ne.s32.totalorder %s1135_s21, 0 }
  0x72   : > { %775 = dma.done.wait (%p1148_p12), [#allocation7], 16  }
  0x73   : > { %777 = vsyncadd (%p1148_p12), [#allocation7], 4294967280 }
  0x74   : > { %249 = sfence }
  0x75   : > { %v282_v0 = vld [vmem:[%s231_s26] sm:$0x3]  ;;  %v811_v1 = vmov 0.0   ;;  %v530_v2 = vld [vmem:[%s231_s26 + $0x2] sm:$0x3]  ;;  %s299_s22 = sld [smem:[#allocation10]] }
  0x76   : > { %279 = vst [vmem:[#allocation2] sm:$0x1] %v811_v1  ;;  %280 = vst [vmem:[#allocation3] sm:$0x1] %v811_v1  ;;  %v531_v3 = vld [vmem:[%s231_s26 + $0x4] sm:$0x3]  ;;  %v285_v4 = vmax.f32 %v282_v0, %v530_v2 }
  0x77   : > { %s533_s9 = sld [smem:[#allocation10 + $0x1]]  ;;  %v532_v5 = vld [vmem:[%s231_s26 + $0x6] sm:$0x3]  ;;  %s534_s4 = sld [smem:[#allocation10 + $0x2]]  ;;  %v1030_v6 = vld [vmem:[%s240_s30] sm:$0x3] }
  0x78   : > { %v288_v7 = vmax.f32 %v285_v4, %v531_v3  ;;  %s535_s23 = sld [smem:[#allocation10 + $0x3]]  ;;  %vm296_vm0 = vcmp.eq.s32.totalorder %v1030_v6, 0  ;;  %vm306_vm1 = vcmp.eq.s32.totalorder %v1030_v6, 1  ;;  %vm316_vm2 = vcmp.eq.s32.totalorder %v1030_v6, 2  ;;  %s1055_s21 = scalar_lea.vmem [#allocation11], %s527_s0 }
  0x79   : > { %vm344_vm3 = vcmask 1041408   ;;  %vm326_vm4 = vcmp.eq.s32.totalorder %v1030_v6, 3  ;;  %s388_s6 = sshll.u32 %s1055_s21, 4  ;;  %s543_s8 = sshll.u32 %s796_s15, 5  ;;  %s1069_s6 = int_to_ptr.vmem [resolvable:$true] %s388_s6 }
  0x7a   : > { %v291_v8 = vmax.f32 %v288_v7, %v532_v5  ;;  %s1074_s18 = scalar_lea.hbm %s1127_s3, %s543_s8  ;;  %s373_s10 = scalar_lea.sflag [#allocation6], %s1010_s2 }
  0x7b   : > { %v300_v10 = vstv %s299_s22  ;;  %s714_s19 = scalar_lea.vmem %s1069_s6, 32  ;;  %p1149_p8 = scmp.ne.s32.totalorder %s1138_s24, 0 }
  0x7c   : > { %v292_v9 = vsub.f32 %v282_v0, %v291_v8  ;;  %v302_v11 = vsub.f32 %v530_v2, %v291_v8  ;;  %v301_v13 = vsel %vm296_vm0, %v300_v10, 0.0  ;;  %v312_v14 = vsub.f32 %v531_v3, %v291_v8  ;;  %p715_p2 = scmp.ne.s32.totalorder %s1069_s6, %s714_s19  ;;  %s812_s20 = smov [#allocation11]  }
  0x7d   : > { %v310_v12 = vstv %s533_s9  ;;  %v320_v15 = vstv %s534_s4  ;;  %v322_v16 = vsub.f32 %v532_v5, %v291_v8  ;;  %v354_v35 = vld [vmem:[#allocation3] sm:$0x1]  ;;  %v343_v3 = vld [vmem:[#allocation2] sm:$0x1]  ;;  %s718_s15 = sshll.u32 %s812_s20, 4  ;;  %s719_s15 = int_to_ptr.vmem [resolvable:$false] %s718_s15 }
  0x7e   : > { %v293_v17 = vmul.f32 1.442695, %v292_v9  ;;  %v303_v18 = vmul.f32 1.442695, %v302_v11  ;;  %v311_v19 = vsel %vm306_vm1, %v310_v12, %v301_v13  ;;  %v313_v20 = vmul.f32 1.442695, %v312_v14  ;;  %p716_p9 = pnand %p715_p2, %p1149_p8  ;;  %p721_p10 = scmp.lt.s32.totalorder %s1069_s6, %s719_s15 }
  0x7f   : > { %v321_v21 = vsel %vm316_vm2, %v320_v15, %v311_v19  ;;  %v323_v22 = vmul.f32 1.442695, %v322_v16  ;;  %v330_v23 = vstv %s535_s23  ;;  %v297_v43 = vsel %vm296_vm0, %v292_v9, 0.0  ;;  %s720_s27 = scalar_lea.vmem %s719_s15, 64 }
  0x80   : > { %627 = vpow2.f32 %v293_v17  ;;  %v331_v24 = vsel %vm326_vm4, %v330_v23, %v321_v21  ;;  %v307_v46 = vsel %vm306_vm1, %v302_v11, %v297_v43  ;;  %p717_p4 = pneg %p716_p9  ;;  %p722_p5 = scmp.lt.s32.totalorder %s720_s27, %s714_s19 }
  0x81   : > { %629 = vpow2.f32 %v303_v18  ;;  %v355_v25 = vsel %vm344_vm3, %v331_v24, 0.0  ;;  %v317_v50 = vsel %vm316_vm2, %v312_v14, %v307_v46 }
  0x82   : > { %631 = vpow2.f32 %v313_v20  ;;  %v356_v26 = vrot.slane %v355_v25, 4  ;;  %v327_v54 = vsel %vm326_vm4, %v322_v16, %v317_v50  ;;  %p723_p11 = por %p722_p5, %p721_p10 }
  0x83   : > { %633 = vpow2.f32 %v323_v22 }
  0x84   : > { %v357_v27 = vadd.f32 %v356_v26, %v355_v25  ;;  %p724_p3 = pnand %p723_p11, %p717_p4 }
  0x86   : > { %v358_v28 = vrot.slane %v357_v27, 2 }
  0x88   : > { %v359_v29 = vadd.f32 %v358_v28, %v357_v27 }
  0x8a   : > { %v628_v30 = vpop.eup %627  ;;  %v360_v32 = vrot.slane %v359_v29, 1 }
  0x8b   : > { %v630_v31 = vpop.eup %629  ;;  %v298_v41 = vsel %vm296_vm0, %v628_v30, 0.0 }
  0x8c   : > { %v632_v33 = vpop.eup %631  ;;  %v305_v34 = vadd.f32 %v630_v31, %v628_v30  ;;  %v361_v37 = vadd.f32 %v360_v32, %v359_v29  ;;  %v308_v42 = vsel %vm306_vm1, %v630_v31, %v298_v41 }
  0x8d   : > { %v634_v36 = vpop.eup %633  ;;  %v318_v44 = vsel %vm316_vm2, %v632_v33, %v308_v42 }
  0x8e   : > { %v315_v38 = vadd.f32 %v632_v33, %v305_v34  ;;  %v362_v39 = vadd.f32 %v361_v37, %v354_v35  ;;  %v328_v47 = vsel %vm326_vm4, %v634_v36, %v318_v44 }
  0x90   : > { %v325_v40 = vadd.f32 %v634_v36, %v315_v38  ;;  %363 = vst [vmem:[#allocation3] sm:$0x1] %v362_v39 }
  0x92   : > { %635 = vlog2.f32 %v325_v40 }
  0x93   : > { %637 = vrcp.f32 %v325_v40 }
  0x97   : > { %v369_v45 = vld [vmem:[#allocation3] sm:$0x1] }
  0x98   : > { %536 = vst [vmem:[%s1055_s21 + $0x1] sm:$0x1] %v369_v45 }
  0x9c   : > { %v636_v48 = vpop.eup %635 }
  0x9d   : > { %v638_v49 = vpop.eup %637  ;;  %v333_v52 = vmul.f32 0.6931472, %v636_v48 }
  0x9e   : > { %v336_v51 = vmul.f32 %v638_v49, %v328_v47 }
  0x9f   : > { %v334_v56 = vsub.f32 %v327_v54, %v333_v52 }
  0xa0   : > { %v337_v53 = vsub.f32 1.0, %v336_v51 }
  0xa2   : > { %v338_v55 = vmax.f32 %v337_v53, 0.0 }
  0xa4   : > { %v339_v57 = vmul.f32 %v338_v55, %v338_v55 }
  0xa6   : > { %v340_v58 = vmul.f32 %v339_v57, %v331_v24 }
  0xa8   : > { %v341_v59 = vmul.f32 %v340_v58, %v334_v56 }
  0xaa   : > { %v342_v60 = vsub.f32 0.0, %v341_v59 }
  0xac   : > { %v345_v61 = vsel %vm344_vm3, %v342_v60, 0.0 }
  0xad   : > { %v346_v62 = vrot.slane %v345_v61, 4 }
  0xaf   : > { %v347_v63 = vadd.f32 %v346_v62, %v345_v61 }
  0xb1   : > { %v348_v0 = vrot.slane %v347_v63, 2 }
  0xb3   : > { %v349_v1 = vadd.f32 %v348_v0, %v347_v63 }
  0xb5   : > { %v350_v2 = vrot.slane %v349_v1, 1 }
  0xb7   : > { %v351_v4 = vadd.f32 %v350_v2, %v349_v1 }
  0xb9   : > { %v352_v5 = vadd.f32 %v351_v4, %v343_v3 }
  0xbb   : > { %353 = vst [vmem:[#allocation2] sm:$0x1] %v352_v5 }
  0xc2   : > { %v367_v6 = vld [vmem:[#allocation2] sm:$0x1] }
  0xc3   : > { %368 = vst [vmem:[%s1055_s21] sm:$0x1] %v367_v6 }
  0xc4   : > { %727 = shalt.err (!%p724_p3)
}
  0xc5   : > { %s728_s26 = scalar_lea.hbm %s1074_s18, 32  ;;  %s732_s30 = scalar_lea.hbm %s1127_s3, 64 }
  0xc6   : > { %p729_p7 = scmp.ne.s32.totalorder %s1074_s18, %s728_s26  ;;  %p733_p6 = scmp.lt.u32.totalorder %s1074_s18, %s1127_s3 }
  0xc7   : > { %p734_p13 = scmp.lt.u32.totalorder %s732_s30, %s728_s26  ;;  %p736_p2 = scmp.lt.u32.totalorder %s728_s26, %s1074_s18 }
  0xc8   : > { %p730_p0 = pnand %p729_p7, %p1149_p8 }
  0xc9   : > { %p735_p12 = por %p734_p13, %p733_p6 }
  0xca   : > { %p731_p1 = pneg %p730_p0 }
  0xcb   : > { %p737_p9 = por %p736_p2, %p735_p12 }
  0xcd   : > { %p738_p4 = pnand %p737_p9, %p731_p1 }
  0xcf   : > { %741 = shalt.err (!%p738_p4)
}
  0xd0   : > { %s813_s4 = smov 16   ;;  %s814_s23 = smov 1  }
  0xd1   : > { %552 = dma.vmem_to_hbm [thread:$0]  (%p1149_p8), %s1069_s6, 32, %s1074_s18, %s373_s10, %s813_s4, %s813_s4, %s814_s23  }
  0xd2 PF: > { %s403_s21 = sand.u32 1, %s784_s12   ;;  %p1150_p10 = scmp.ne.s32.totalorder %s1139_s25, 0 }
  0xd3   : > { %p1151_p5 = scmp.ge.s32.totalorder %s804_s17, 2  ;;  %s404_s8 = scalar_lea.sflag [#allocation6], %s403_s21 }
  0xd5   : > { %p566_p11 = pnand %p1151_p5, %p1150_p10 }
  0xd7   : > { %779 = dma.done.wait (!%p566_p11), %s404_s8, 32  }
  0xd8   : > { %781 = vsyncadd (!%p566_p11), %s404_s8, 4294967264  ;;  %s23_s17 = sadd.s32 1, %s804_s17   ;;  %s1152_s12 = smov %s788_s13 }
  0xd9   : > { %p20_p3 = scmp.ge.s32.totalorder %s23_s17, 4   ;;  %s1153_s13 = smov %s792_s14 }
  0xda   : > { %s1154_s14 = smov %s948_s28  ;;  %s1155_s15 = smov %s800_s16 }
  0xdb   : > { %s1156_s16 = smov %s1158_s5  ;;  %22 = sbr.rel (!%p20_p3) target bundleno = 12 (0xc), region = 107 }
  0xe2   :  { %409 = vsyncpa [#allocation5], 1 }
  0xe3   :  { %411 = vsyncpa [#allocation5 + $0x1], 1 }
  0xe4   :  { %412 = vsyncpa [#allocation9], 1 }
  0xe5   :  { %414 = vsyncpa [#allocation9 + $0x1], 1 }
  0xe6   :  { %415 = vsyncpa [#allocation6], 1 }
  0xe7   :  { %417 = vsyncpa [#allocation6 + $0x1], 1 }
  0xe8   :  { %418 = vsyncpa [#allocation7], 1 }
  0xe9   :  { %420 = vsyncpa [#allocation7 + $0x1], 1 }

</bundles_post_ra>
